<compile_context>
chip_gen: v7x
topology: tpu7x:2x2x1
jax: 0.10.0
libtpu: 0.0.40
codegen_flags: <defaults>
</compile_context>

<pallas_src>
import functools

import jax
import jax.numpy as jnp
from jax.experimental import pallas as pl
from jax.experimental.pallas import tpu as pltpu

_LANES = 128
_SUBLANES = 8


def _disturb_label_kernel(y_ref, u_keep_ref, u_cls_ref, o_ref, *, C, q):
    """Keep-or-resample DisturbLabel on one (tile_rows, 128) tile.

    All work is pure VPU elementwise: one compare, one mul, one convert,
    one min, one select per element.
    """
    y = y_ref[...]                                    # (tile_r, 128) int32
    replace = u_keep_ref[...] < jnp.float32(q)        # Bernoulli(alpha/100)
    # Uniform class pick in [0, C): floor(u * C), clamped for float rounding.
    new_cls = jnp.minimum(
        (u_cls_ref[...] * jnp.float32(C)).astype(jnp.int32),
        jnp.int32(C - 1),
    )
    o_ref[...] = jnp.where(replace, new_cls, y)


def disturb_label(y, key, *, alpha, C, tile_rows=512):
    """JAX/Pallas equivalent of DisturbLabel(alpha, C).forward(y).

    y: integer labels (any shape; flattened internally).
    key: jax.random key used for the stochastic disturbance.
    Returns labels of the same shape, dtype int32.
    """
    orig_shape = y.shape
    y_flat = y.reshape(-1).astype(jnp.int32)
    N = y_flat.shape[0]
    q = float(alpha) / 100.0

    # Lane-dense layout: N -> (rows, 128), rows a multiple of 8 and of the
    # grid tile so every block is a full, aligned (tile_r, 128) slab.
    rows = max(1, pl.cdiv(N, _LANES))
    rows = pl.cdiv(rows, _SUBLANES) * _SUBLANES
    tile_r = min(int(tile_rows), rows)
    tile_r = max(_SUBLANES, (tile_r // _SUBLANES) * _SUBLANES)
    rows = pl.cdiv(rows, tile_r) * tile_r
    padded = rows * _LANES
    grid = (rows // tile_r,)

    y_pad = jnp.zeros((padded,), jnp.int32).at[:N].set(y_flat)
    y2 = y_pad.reshape(rows, _LANES)

    k_keep, k_cls = jax.random.split(key)
    u_keep = jax.random.uniform(k_keep, (rows, _LANES), dtype=jnp.float32)
    u_cls = jax.random.uniform(k_cls, (rows, _LANES), dtype=jnp.float32)

    kernel = functools.partial(_disturb_label_kernel, C=int(C), q=q)
    tile_spec = pl.BlockSpec((tile_r, _LANES), lambda i: (i, 0))

    out = pl.pallas_call(
        kernel,
        out_shape=jax.ShapeDtypeStruct((rows, _LANES), jnp.int32),
        grid=grid,
        in_specs=[tile_spec, tile_spec, tile_spec],
        out_specs=tile_spec,
        compiler_params=pltpu.CompilerParams(
            dimension_semantics=("parallel",),
        ),
    )(y2, u_keep, u_cls)

    # Drop the padded tail so padded garbage never reaches the caller.
    return out.reshape(-1)[:N].reshape(orig_shape)


if __name__ == "__main__":
    key = jax.random.PRNGKey(0)
    k_labels, k_disturb, k_disturb2 = jax.random.split(key, 3)

    # Small shape consistent with the module: a batch of 8 labels, C=10.
    N, C, alpha = 8, 10, 20.0
    y = jax.random.randint(k_labels, (N,), 0, C, dtype=jnp.int32)

    y_disturbed = disturb_label(y, k_disturb, alpha=alpha, C=C)
    jax.block_until_ready(y_disturbed)
    assert y_disturbed.shape == y.shape
    assert bool(jnp.all((y_disturbed >= 0) & (y_disturbed < C)))

    # alpha = 0 must be a no-op (p_c = 1, p_i = 0).
    y_same = disturb_label(y, k_disturb, alpha=0.0, C=C)
    jax.block_until_ready(y_same)
    assert bool(jnp.array_equal(y_same, y))

    # Exercise the multi-tile grid path with a tiny tile size.
    N2 = 2048
    y_big = jax.random.randint(k_labels, (N2,), 0, C, dtype=jnp.int32)
    y_big_d = disturb_label(y_big, k_disturb2, alpha=alpha, C=C, tile_rows=8)
    jax.block_until_ready(y_big_d)
    assert y_big_d.shape == y_big.shape
    assert bool(jnp.all((y_big_d >= 0) & (y_big_d < C)))

    print("KERNEL_OK")
</pallas_src>

<mosaic_0001>
module attributes {stable_mosaic.version = 11 : i64} {
  func.func @_disturb_label_kernel(%arg0: i32, %arg1: memref<8x128xi32, #tpu.memory_space<vmem>>, %arg2: memref<8x128xf32, #tpu.memory_space<vmem>>, %arg3: memref<8x128xf32, #tpu.memory_space<vmem>>, %arg4: memref<8x128xi32, #tpu.memory_space<vmem>>) attributes {dimension_semantics = [#tpu.dimension_semantics<parallel>], iteration_bounds = array<i64: 1>, scalar_prefetch = 0 : i64, scratch_operands = 0 : i64, tpu.core_type = #tpu.core_type<tc>, window_params = [{transform_indices = @transform_0, window_bounds = array<i64: 8, 128>}, {transform_indices = @transform_1, window_bounds = array<i64: 8, 128>}, {transform_indices = @transform_2, window_bounds = array<i64: 8, 128>}, {transform_indices = @transform_3, window_bounds = array<i64: 8, 128>}]} {
    %c0 = arith.constant 0 : index
    %c0_0 = arith.constant 0 : index
    %0 = vector.load %arg1[%c0, %c0_0] : memref<8x128xi32, #tpu.memory_space<vmem>>, vector<8x128xi32>
    %c0_1 = arith.constant 0 : index
    %c0_2 = arith.constant 0 : index
    %1 = vector.load %arg2[%c0_1, %c0_2] : memref<8x128xf32, #tpu.memory_space<vmem>>, vector<8x128xf32>
    %cst = arith.constant 2.000000e-01 : f32
    %2 = vector.broadcast %cst : f32 to vector<8x128xf32>
    %3 = arith.cmpf olt, %1, %2 : vector<8x128xf32>
    %c0_3 = arith.constant 0 : index
    %c0_4 = arith.constant 0 : index
    %4 = vector.load %arg3[%c0_3, %c0_4] : memref<8x128xf32, #tpu.memory_space<vmem>>, vector<8x128xf32>
    %cst_5 = arith.constant 1.000000e+01 : f32
    %5 = vector.broadcast %cst_5 : f32 to vector<8x128xf32>
    %6 = arith.mulf %4, %5 : vector<8x128xf32>
    %7 = arith.fptosi %6 : vector<8x128xf32> to vector<8x128xi32>
    %c9_i32 = arith.constant 9 : i32
    %8 = vector.broadcast %c9_i32 : i32 to vector<8x128xi32>
    %9 = arith.minsi %7, %8 : vector<8x128xi32>
    %10 = arith.select %3, %9, %0 : vector<8x128xi1>, vector<8x128xi32>
    %c0_6 = arith.constant 0 : index
    %c0_7 = arith.constant 0 : index
    %11 = vector.load %arg4[%c0_6, %c0_7] : memref<8x128xi32, #tpu.memory_space<vmem>>, vector<8x128xi32>
    tpu.vector_store %arg4[%c0_6, %c0_7], %10 {strides = array<i32>} : memref<8x128xi32, #tpu.memory_space<vmem>>, vector<8x128xi32>,
    return
  }
  func.func @transform_0(%arg0: i32) -> (i32, i32) {
    %c0_i32 = arith.constant 0 : i32
    %c0_i32_0 = arith.constant 0 : i32
    return %arg0, %c0_i32 : i32, i32
  }
  func.func @transform_1(%arg0: i32) -> (i32, i32) {
    %c0_i32 = arith.constant 0 : i32
    %c0_i32_0 = arith.constant 0 : i32
    return %arg0, %c0_i32 : i32, i32
  }
  func.func @transform_2(%arg0: i32) -> (i32, i32) {
    %c0_i32 = arith.constant 0 : i32
    %c0_i32_0 = arith.constant 0 : i32
    return %arg0, %c0_i32 : i32, i32
  }
  func.func @transform_3(%arg0: i32) -> (i32, i32) {
    %c0_i32 = arith.constant 0 : i32
    %c0_i32_0 = arith.constant 0 : i32
    return %arg0, %c0_i32 : i32, i32
  }
}

</mosaic_0001>

<bundles_post_ra>
// kernel: tpu_custom_call.1
= control target key start
LH: loop header
LB: loop body
LE: loop exit
PB: predicated region body
PF: predicated region fallthrough
CT: control target
= control target key end

     0   :  { %8 = vsyncpa [#allocation3], 0  ;;  %s248_s0 = inlined_call_operand.hbm [shape: s32[8,128], index: 0, kind: input, shape index: {}]   ;;  %s249_s1 = inlined_call_operand.hbm [shape: f32[8,128], index: 1, kind: input, shape index: {}]   ;;  %s250_s2 = inlined_call_operand.hbm [shape: f32[8,128], index: 2, kind: input, shape index: {}]   ;;  %s251_s3 = inlined_call_operand.hbm [shape: s32[8,128], index: 3, kind: output, shape index: {}]  }
   0x1   :  { %9 = vsyncpa [#allocation6], 0 }
   0x2   :  { %10 = vsyncpa [#allocation4], 0  ;;  %s176_s12 = smov [#allocation5]   ;;  %s177_s14 = smov [#allocation2]  }
   0x3   :  { %s27_s13 = sshll.u32 %s176_s12, 4  ;;  %s17_s15 = sshll.u32 %s177_s14, 4  ;;  %s28_s13 = int_to_ptr.vmem [resolvable:$true] %s27_s13  ;;  %s18_s15 = int_to_ptr.vmem [resolvable:$true] %s17_s15 }
   0x4   :  { %s82_s18 = scalar_lea.hbm %s249_s1, 128 }
   0x5   :  { %p83_p0 = scmp.ne.s32.totalorder %s249_s1, %s82_s18  ;;  %p86_p1 = scmp.lt.u32.totalorder %s82_s18, %s249_s1 }
   0x7   :  { %p88_p2 = pnand %p86_p1, %p83_p0 }
   0x9   :  { %91 = shalt.err (!%p88_p2)
}
   0xa   :  { %s92_s23 = scalar_lea.vmem %s28_s13, 128  ;;  %p97_p4 = scmp.lt.s32.totalorder %s28_s13, %s28_s13 }
   0xb   :  { %p93_p3 = scmp.ne.s32.totalorder %s28_s13, %s92_s23  ;;  %p98_p5 = scmp.lt.s32.totalorder %s92_s23, %s92_s23 }
   0xd   :  { %p99_p6 = por %p98_p5, %p97_p4 }
   0xf   :  { %p100_p7 = pnand %p99_p6, %p93_p3 }
  0x11   :  { %103 = shalt.err (!%p100_p7)
}
  0x12   :  { %30 = dma.hbm_to_vmem [thread:$0]  %s249_s1, 128, %s28_s13, [#allocation6]  }
  0x13   :  { %s104_s28 = scalar_lea.hbm %s248_s0, 128 }
  0x14   :  { %p105_p8 = scmp.ne.s32.totalorder %s248_s0, %s104_s28  ;;  %p108_p9 = scmp.lt.u32.totalorder %s104_s28, %s248_s0 }
  0x16   :  { %p110_p10 = pnand %p108_p9, %p105_p8 }
  0x18   :  { %113 = shalt.err (!%p110_p10)
}
  0x19   :  { %s114_s6 = scalar_lea.vmem %s18_s15, 128  ;;  %p119_p12 = scmp.lt.s32.totalorder %s18_s15, %s18_s15 }
  0x1a   :  { %p115_p11 = scmp.ne.s32.totalorder %s18_s15, %s114_s6  ;;  %p120_p13 = scmp.lt.s32.totalorder %s114_s6, %s114_s6 }
  0x1c   :  { %p121_p0 = por %p120_p13, %p119_p12 }
  0x1e   :  { %p122_p1 = pnand %p121_p0, %p115_p11 }
  0x20   :  { %125 = shalt.err (!%p122_p1)
}
  0x21   :  { %20 = dma.hbm_to_vmem [thread:$0]  %s248_s0, 128, %s18_s15, [#allocation3]  }
  0x22   :  { %s178_s8 = smov [#allocation7]   ;;  %s126_s12 = scalar_lea.hbm %s250_s2, 128 }
  0x23   :  { %s37_s9 = sshll.u32 %s178_s8, 4  ;;  %p127_p2 = scmp.ne.s32.totalorder %s250_s2, %s126_s12  ;;  %s38_s9 = int_to_ptr.vmem [resolvable:$true] %s37_s9 }
  0x24   :  { %p130_p3 = scmp.lt.u32.totalorder %s126_s12, %s250_s2 }
  0x26   :  { %p132_p4 = pnand %p130_p3, %p127_p2 }
  0x28   :  { %135 = shalt.err (!%p132_p4)
}
  0x29   :  { %s136_s18 = scalar_lea.vmem %s38_s9, 128  ;;  %p141_p6 = scmp.lt.s32.totalorder %s38_s9, %s38_s9 }
  0x2a   :  { %p137_p5 = scmp.ne.s32.totalorder %s38_s9, %s136_s18  ;;  %p142_p7 = scmp.lt.s32.totalorder %s136_s18, %s136_s18 }
  0x2c   :  { %p143_p8 = por %p142_p7, %p141_p6 }
  0x2e   :  { %p144_p9 = pnand %p143_p8, %p137_p5 }
  0x30   :  { %147 = shalt.err (!%p144_p9)
}
  0x31   :  { %40 = dma.hbm_to_vmem [thread:$0]  %s250_s2, 128, %s38_s9, [#allocation6]  }
  0x32   :  { %170 = dma.done.wait [#allocation3], 128  }
  0x33   :  { %171 = vsyncadd [#allocation3], 4294967168 }
  0x34   :  { %172 = dma.done.wait [#allocation6], 256  }
  0x35   :  { %173 = vsyncadd [#allocation6], 4294967040  ;;  %v53_v0 = vld [vmem:[#allocation7] sm:$0xff]  ;;  %v51_v2 = vld [vmem:[#allocation5] sm:$0xff]  ;;  %s179_s19 = smov [#allocation8]  }
  0x36   :  { %v54_v1 = vmul.f32 10.0, %v53_v0  ;;  %s66_s20 = sshll.u32 %s179_s19, 4  ;;  %v50_v5 = vld [vmem:[#allocation2] sm:$0xff]  ;;  %vm52_vm0 = vcmp.lt.f32.partialorder %v51_v2, 0.2  ;;  %s67_s20 = int_to_ptr.vmem [resolvable:$true] %s66_s20 }
  0x37   :  { %s148_s21 = scalar_lea.vmem %s67_s20, 128  ;;  %p153_p11 = scmp.lt.s32.totalorder %s67_s20, %s67_s20 }
  0x38   :  { %v76_v3 = vtrunc.f32 %v54_v1  ;;  %p149_p10 = scmp.ne.s32.totalorder %s67_s20, %s148_s21  ;;  %p154_p12 = scmp.lt.s32.totalorder %s148_s21, %s148_s21 }
  0x3a   :  { %v77_v4 = vcvt.f32.s32 %v76_v3  ;;  %p155_p13 = por %p154_p12, %p153_p11 }
  0x3c   :  { %vm56_vm1 = vcmp.lt.s32.totalorder %v77_v4, 9  ;;  %p156_p0 = pnand %p155_p13, %p149_p10 }
  0x3d   :  { %v57_v6 = vsel %vm56_vm1, %v77_v4, 9 }
  0x3e   :  { %v58_v7 = vsel %vm52_vm0, %v57_v6, %v50_v5 }
  0x3f   :  { %59 = vst [vmem:[#allocation8] sm:$0xff] %v58_v7 }
  0x40   :  { %159 = shalt.err (!%p156_p0)
}
  0x41   :  { %s160_s23 = scalar_lea.hbm %s251_s3, 128 }
  0x42   :  { %p161_p1 = scmp.ne.s32.totalorder %s251_s3, %s160_s23  ;;  %p164_p2 = scmp.lt.u32.totalorder %s160_s23, %s251_s3 }
  0x44   :  { %p166_p3 = pnand %p164_p2, %p161_p1 }
  0x46   :  { %169 = shalt.err (!%p166_p3)
}
  0x47   :  { %69 = dma.vmem_to_hbm [thread:$0]  %s67_s20, 128, %s251_s3, [#allocation4]  }
  0x48   :  { %174 = dma.done.wait [#allocation4], 128  }
  0x49   :  { %175 = vsyncadd [#allocation4], 4294967168 }
  0x4a   :  { %73 = vsyncpa [#allocation3], 1 }
  0x4b   :  { %74 = vsyncpa [#allocation6], 1 }
  0x4c   :  { %75 = vsyncpa [#allocation4], 1 }

</bundles_post_ra>
